<compile_context>
chip_gen: v7x
topology: tpu7x:2x2x1
jax: 0.10.0
libtpu: 0.0.40
codegen_flags: <defaults>
</compile_context>

<pallas_src>
import jax
import jax.numpy as jnp
from jax.experimental import pallas as pl
from jax.experimental.pallas import tpu as pltpu


# ---------------------------------------------------------------------------
# Helpers
# ---------------------------------------------------------------------------

PRICE_BINS = 20

_tpu_info_cache = {}


def _round_up(x, m):
    return ((x + m - 1) // m) * m


def _tile_divisor(n, quantum, cap):
    """Largest multiple of `quantum` that divides n and is <= cap (n % quantum == 0)."""
    if n <= quantum:
        return n
    best = quantum
    d = quantum
    limit = min(n, cap)
    while d <= limit:
        if n % d == 0:
            best = d
        d += quantum
    return best


def _vmem_capacity_bytes():
    if "cap" not in _tpu_info_cache:
        try:
            _tpu_info_cache["cap"] = int(pltpu.get_tpu_info().vmem_capacity_bytes)
        except Exception:
            _tpu_info_cache["cap"] = 64 * 1024 * 1024  # conservative (v7x per-core)
    return _tpu_info_cache["cap"]


def _vmem_limit_bytes():
    cap = _vmem_capacity_bytes()
    return max(32 * 1024 * 1024, min((cap * 3) // 4, 96 * 1024 * 1024))


def _recurrence_vmem_budget():
    cap = _vmem_capacity_bytes()
    return max(16 * 1024 * 1024, min(cap // 2, 64 * 1024 * 1024))


def _choose_seq_chunk(S, batch_tile, Hp, budget, act_bytes=2):
    """Biggest seq chunk whose recurrence working set fits the VMEM budget."""
    per_step = 2 * batch_tile * (4 * Hp + Hp) * act_bytes       # gx + y, double-buffered
    fixed = (2 * Hp * 4 * Hp * act_bytes                        # whh (2 bufs)
             + 10 * batch_tile * Hp * 4)                        # h0/c0/hn/cn bufs + carry scratch
    avail = max(budget - fixed, per_step)
    max_chunk = int(max(1, min(64, avail // per_step, S)))
    best_div = 1
    for c in range(1, max_chunk + 1):
        if S % c == 0:
            best_div = c
    if best_div >= 8 or best_div * 2 >= max_chunk:
        return best_div          # divides S -> no padding / masking needed
    return max_chunk             # pad S up; carry is masked for padded steps


# ---------------------------------------------------------------------------
# Pallas kernels
# ---------------------------------------------------------------------------

def _matmul_bias_kernel(x_ref, w_ref, b_ref, o_ref, acc_ref):
    """Tiled  O = X @ W + b  with f32 accumulation.  Grid = (M, N, K) tiles."""
    @pl.when(pl.program_id(2) == 0)
    def _():
        acc_ref[...] = jnp.zeros_like(acc_ref)

    acc_ref[...] += jnp.dot(x_ref[...], w_ref[...],
                            preferred_element_type=jnp.float32)

    @pl.when(pl.program_id(2) == pl.num_programs(2) - 1)
    def _():
        o_ref[...] = (acc_ref[...] + b_ref[...].astype(jnp.float32)
                      ).astype(o_ref.dtype)


def _make_lstm_kernel(hp, seq_chunk, s_real, mask_tail):
    """Recurrent part of one LSTM layer (gate order i, f, o, g after repack).

    gx_ref : (seq_chunk, batch_tile, 4*Hp)  bf16, time-major, x@Wih + b folded in
    whh_ref: (Hp, 4*Hp) bf16
    h0/c0  : (batch_tile, Hp) f32
    y_ref  : (seq_chunk, batch_tile, Hp) bf16
    hn/cn  : (batch_tile, Hp) f32
    Grid: (batch tiles ["parallel"], seq chunks ["arbitrary"]); h/c carried in
    f32 VMEM scratch across the sequence axis.
    """
    def kernel(gx_ref, whh_ref, h0_ref, c0_ref,
               y_ref, hn_ref, cn_ref, h_scr, c_scr):
        si = pl.program_id(1)
        n_si = pl.num_programs(1)

        @pl.when(si == 0)
        def _():
            h_scr[...] = h0_ref[...]
            c_scr[...] = c0_ref[...]

        base_t = si * seq_chunk

        def step(t, carry):
            h, c = carry                                        # f32 (bt, Hp)
            gates = gx_ref[t].astype(jnp.float32) + jnp.dot(
                h.astype(whh_ref.dtype), whh_ref[...],
                preferred_element_type=jnp.float32)
            sig = jax.nn.sigmoid(gates[:, 0:3 * hp])            # i | f | o (one EUP op)
            g_g = jnp.tanh(gates[:, 3 * hp:4 * hp])
            i_g = sig[:, 0:hp]
            f_g = sig[:, hp:2 * hp]
            o_g = sig[:, 2 * hp:3 * hp]
            c_new = f_g * c + i_g * g_g
            h_new = o_g * jnp.tanh(c_new)
            if mask_tail:                                       # padded timesteps
                valid = (base_t + t) < s_real
                h_new = jnp.where(valid, h_new, h)
                c_new = jnp.where(valid, c_new, c)
            y_ref[t] = h_new.astype(y_ref.dtype)
            return h_new, c_new

        h_fin, c_fin = jax.lax.fori_loop(0, seq_chunk, step,
                                         (h_scr[...], c_scr[...]),
                                         unroll=min(seq_chunk, 4))
        h_scr[...] = h_fin
        c_scr[...] = c_fin

        @pl.when(si == n_si - 1)
        def _():
            hn_ref[...] = h_fin
            cn_ref[...] = c_fin

    return kernel


# ---------------------------------------------------------------------------
# pallas_call wrappers
# ---------------------------------------------------------------------------

def matmul_bias(x, w, b, *, out_dtype=jnp.float32, tm_cap=512, tn_cap=512):
    """Tiled, pipelined  x @ w + b.  M and N must already be 8/128-aligned
    (no pad/slice copies); K uses a full-extent block unless it is very large."""
    M, K = x.shape
    Kw, N = w.shape
    assert K == Kw and b.shape == (1, N)
    assert M % 8 == 0 and N % 128 == 0, (M, N)

    tm = _tile_divisor(M, 8, tm_cap)
    tn = _tile_divisor(N, 128, tn_cap)
    if K <= 2048:
        tk = K                                   # full-K block: legal for any K
        xk, wk = x, w
    else:
        tk = 1024
        Kp = _round_up(K, tk)
        xk = jnp.pad(x, ((0, 0), (0, Kp - K)))
        wk = jnp.pad(w, ((0, Kp - K), (0, 0)))
    Kp = xk.shape[1]

    grid = (M // tm, N // tn, Kp // tk)
    return pl.pallas_call(
        _matmul_bias_kernel,
        out_shape=jax.ShapeDtypeStruct((M, N), out_dtype),
        grid_spec=pltpu.PrefetchScalarGridSpec(
            num_scalar_prefetch=0,
            grid=grid,
            in_specs=[pl.BlockSpec((tm, tk), lambda i, j, k: (i, k)),
                      pl.BlockSpec((tk, tn), lambda i, j, k: (k, j)),
                      pl.BlockSpec((1, tn), lambda i, j, k: (0, j))],
            out_specs=pl.BlockSpec((tm, tn), lambda i, j, k: (i, j)),
            scratch_shapes=[pltpu.VMEM((tm, tn), jnp.float32)]),
        compiler_params=pltpu.CompilerParams(
            dimension_semantics=("parallel", "parallel", "arbitrary"),
            vmem_limit_bytes=_vmem_limit_bytes()),
    )(xk, wk, b)


def run_lstm_layer(gates_x, whh, h0, c0, *, batch_tile, seq_chunk, s_real,
                   y_dtype=jnp.bfloat16):
    """Run the recurrent part of one LSTM layer.

    gates_x: (Sp, Bp, 4*Hp) bf16 time-major precomputed input gates (bias folded).
    Returns y: (Sp, Bp, Hp) bf16, h_n: (Bp, Hp) f32, c_n: (Bp, Hp) f32.
    """
    Sp, Bp, G = gates_x.shape
    Hp = G // 4
    grid = (Bp // batch_tile, Sp // seq_chunk)
    kernel = _make_lstm_kernel(Hp, seq_chunk, s_real, mask_tail=(Sp != s_real))

    return pl.pallas_call(
        kernel,
        out_shape=(jax.ShapeDtypeStruct((Sp, Bp, Hp), y_dtype),
                   jax.ShapeDtypeStruct((Bp, Hp), jnp.float32),
                   jax.ShapeDtypeStruct((Bp, Hp), jnp.float32)),
        grid_spec=pltpu.PrefetchScalarGridSpec(
            num_scalar_prefetch=0,
            grid=grid,
            in_specs=[
                pl.BlockSpec((seq_chunk, batch_tile, G),
                             lambda bi, si: (si, bi, 0)),
                pl.BlockSpec((Hp, G), lambda bi, si: (0, 0)),
                pl.BlockSpec((batch_tile, Hp), lambda bi, si: (bi, 0)),
                pl.BlockSpec((batch_tile, Hp), lambda bi, si: (bi, 0)),
            ],
            out_specs=(
                pl.BlockSpec((seq_chunk, batch_tile, Hp),
                             lambda bi, si: (si, bi, 0)),
                pl.BlockSpec((batch_tile, Hp), lambda bi, si: (bi, 0)),
                pl.BlockSpec((batch_tile, Hp), lambda bi, si: (bi, 0)),
            ),
            scratch_shapes=[pltpu.VMEM((batch_tile, Hp), jnp.float32),
                            pltpu.VMEM((batch_tile, Hp), jnp.float32)]),
        compiler_params=pltpu.CompilerParams(
            dimension_semantics=("parallel", "arbitrary"),
            vmem_limit_bytes=_vmem_limit_bytes()),
    )(gates_x, whh, h0, c0)


# ---------------------------------------------------------------------------
# Model: parameter init + forward
# ---------------------------------------------------------------------------

_GATE_PERM = (0, 1, 3, 2)   # pytorch gate order (i,f,g,o) -> kernel order (i,f,o,g)


def _repack_gates(w, H, Hp):
    """Reorder gate blocks to i,f,o,g and pad each from H to Hp columns."""
    parts = []
    for k in _GATE_PERM:
        g = w[..., k * H:(k + 1) * H]
        if Hp != H:
            pad_cfg = [(0, 0)] * (w.ndim - 1) + [(0, Hp - H)]
            g = jnp.pad(g, pad_cfg)
        parts.append(g)
    return jnp.concatenate(parts, axis=-1)


def init_params(key, num_items, embedding_dim, hidden_size, num_layers,
                padding_idx, price_embedding_dim):
    keys = jax.random.split(key, 8)
    lstm_input_size = embedding_dim + price_embedding_dim
    H = hidden_size
    Hp = _round_up(H, 128)            # lane-aligned hidden; 4*Hp is MXU-aligned
    Np = _round_up(num_items, 128)    # lane-aligned logits, no pad/slice in the matmul

    # Embedding tables (torch default: N(0,1); padding row zeroed).
    item_emb = jax.random.normal(keys[0], (num_items, embedding_dim), jnp.float32)
    item_emb = item_emb.at[padding_idx].set(0.0)
    price_emb = jax.random.normal(keys[1], (PRICE_BINS, price_embedding_dim),
                                  jnp.float32)

    # LSTM weights (torch default: U(-1/sqrt(H), 1/sqrt(H))), pre-transposed to
    # (in, 4H), gate-reordered i,f,o,g, padded to lane-aligned layout, stored bf16.
    bound = 1.0 / jnp.sqrt(H)
    wih, whh, bias = [], [], []
    lkeys = jax.random.split(keys[2], num_layers * 4)
    for layer in range(num_layers):
        in_size = lstm_input_size if layer == 0 else H
        k0, k1, k2, k3 = lkeys[4 * layer:4 * layer + 4]
        w_ih = jax.random.uniform(k0, (in_size, 4 * H), jnp.float32, -bound, bound)
        w_hh = jax.random.uniform(k1, (H, 4 * H), jnp.float32, -bound, bound)
        b_ih = jax.random.uniform(k2, (1, 4 * H), jnp.float32, -bound, bound)
        b_hh = jax.random.uniform(k3, (1, 4 * H), jnp.float32, -bound, bound)

        w_ih_p = _repack_gates(w_ih, H, Hp)                      # (in, 4Hp)
        if layer > 0 and Hp != H:                                # pad input rows
            w_ih_p = jnp.pad(w_ih_p, ((0, Hp - H), (0, 0)))
        w_hh_p = _repack_gates(w_hh, H, Hp)
        if Hp != H:
            w_hh_p = jnp.pad(w_hh_p, ((0, Hp - H), (0, 0)))      # (Hp, 4Hp)
        b_p = _repack_gates(b_ih + b_hh, H, Hp)                  # (1, 4Hp) f32

        wih.append(w_ih_p.astype(jnp.bfloat16))
        whh.append(w_hh_p.astype(jnp.bfloat16))
        bias.append(b_p)

    # Output projection Linear(hidden_size, num_items): pre-transposed, rows
    # padded to Hp (zeros => padded lanes ignored), columns padded to Np once.
    obound = 1.0 / jnp.sqrt(H)
    w_out = jax.random.uniform(keys[3], (H, num_items), jnp.float32, -obound, obound)
    b_out = jax.random.uniform(keys[4], (1, num_items), jnp.float32, -obound, obound)
    w_out = jnp.pad(w_out, ((0, Hp - H), (0, Np - num_items)))
    b_out = jnp.pad(b_out, ((0, 0), (0, Np - num_items)))

    return dict(item_emb=item_emb, price_emb=price_emb,
                wih=wih, whh=whh, bias=bias,
                w_out=w_out.astype(jnp.bfloat16), b_out=b_out,
                hidden_size=H, hidden_padded=Hp, num_layers=num_layers,
                num_items=num_items, num_items_padded=Np, padding_idx=padding_idx)


def discretize_prices(prices):
    prices_clamped = jnp.clip(prices, 0.0, 1000.0)
    bins = (prices_clamped / 50.0).astype(jnp.int32)
    return jnp.clip(bins, 0, PRICE_BINS - 1)


def forward(params, item_seq, price_seq, hidden_state=None):
    B, S = item_seq.shape
    H = params['hidden_size']
    Hp = params['hidden_padded']
    L = params['num_layers']
    num_items = params['num_items']
    Np = params['num_items_padded']
    pad_idx = params['padding_idx']

    # Batch padded to sublanes; >=2 batch tiles (when Bp>=16) so both v7x
    # TensorCores work during the serial recurrence; tile capped at 64 for vreg
    # pressure.  Sequence chunk derived from a generation-aware VMEM budget.
    Bp = _round_up(B, 8)
    if Bp >= 16:
        batch_tile = min(64, _round_up(Bp // 2, 8))
    else:
        batch_tile = Bp
    Bp = _round_up(Bp, batch_tile)

    seq_chunk = _choose_seq_chunk(S, batch_tile, Hp, _recurrence_vmem_budget())
    Sp = _round_up(S, seq_chunk)

    if Bp != B or Sp != S:
        item_p = jnp.pad(item_seq, ((0, Bp - B), (0, Sp - S)),
                         constant_values=pad_idx)
        price_p = jnp.pad(price_seq, ((0, Bp - B), (0, Sp - S)))
    else:
        item_p, price_p = item_seq, price_seq

    # Gather embeddings directly into time-major layout (Sp, Bp, F); activations
    # stream through the model in bf16 (f32 accumulation inside the kernels).
    item_embs = jnp.take(params['item_emb'], item_p.T, axis=0)          # (Sp,Bp,E)
    price_bins = discretize_prices(price_p.T)
    price_embs = jnp.take(params['price_emb'], price_bins, axis=0)      # (Sp,Bp,P)
    x = jnp.concatenate([item_embs, price_embs], axis=-1).astype(jnp.bfloat16)
    # Dropout: identity at inference.

    if hidden_state is None:
        h0 = jnp.zeros((L, Bp, Hp), jnp.float32)
        c0 = jnp.zeros((L, Bp, Hp), jnp.float32)
    else:
        h0_in, c0_in = hidden_state
        h0 = jnp.zeros((L, Bp, Hp), jnp.float32).at[:, :B, :H].set(
            h0_in.astype(jnp.float32))
        c0 = jnp.zeros((L, Bp, Hp), jnp.float32).at[:, :B, :H].set(
            c0_in.astype(jnp.float32))

    h_finals, c_finals = [], []
    for layer in range(L):
        fin = x.shape[-1]
        # Hoisted input projection + bias: one tiled MXU matmul over the entire
        # sequence (Sp*Bp rows); layer-0 uses a full-K (=32) block, no K padding.
        gates_x = matmul_bias(x.reshape(Sp * Bp, fin),
                              params['wih'][layer], params['bias'][layer],
                              out_dtype=jnp.bfloat16)
        gates_x = gates_x.reshape(Sp, Bp, 4 * Hp)
        x, h_n, c_n = run_lstm_layer(gates_x, params['whh'][layer],
                                     h0[layer], c0[layer],
                                     batch_tile=batch_tile,
                                     seq_chunk=seq_chunk, s_real=S)
        # Inter-layer dropout: identity at inference.
        h_finals.append(h_n)
        c_finals.append(c_n)

    # Single bf16 transpose of the Hp-wide hidden tensor; the Np-wide logits are
    # produced directly batch-major with no pad/slice copies inside the matmul.
    y_bm = jnp.transpose(x, (1, 0, 2)).reshape(Bp * Sp, Hp)
    logits = matmul_bias(y_bm, params['w_out'], params['b_out'],
                         out_dtype=jnp.float32, tm_cap=512, tn_cap=512)
    logits = logits.reshape(Bp, Sp, Np)[:B, :S, :num_items]

    h_n = jnp.stack(h_finals, axis=0)[:, :B, :H]
    c_n = jnp.stack(c_finals, axis=0)[:, :B, :H]
    return logits, (h_n, c_n)


# ---------------------------------------------------------------------------
# Demo
# ---------------------------------------------------------------------------

if __name__ == "__main__":
    num_items = 64
    embedding_dim = 16
    hidden_size = 32
    num_layers = 2
    padding_idx = 0
    price_embedding_dim = 16
    batch, seq_len = 2, 8

    key = jax.random.PRNGKey(0)
    k_param, k_items, k_prices = jax.random.split(key, 3)

    params = init_params(k_param, num_items, embedding_dim, hidden_size,
                         num_layers, padding_idx, price_embedding_dim)

    item_seq = jax.random.randint(k_items, (batch, seq_len), 0, num_items,
                                  dtype=jnp.int32)
    price_seq = jax.random.uniform(k_prices, (batch, seq_len), jnp.float32,
                                   0.0, 300.0)

    logits, (h_n, c_n) = forward(params, item_seq, price_seq)
    jax.block_until_ready((logits, h_n, c_n))

    assert logits.shape == (batch, seq_len, num_items)
    assert h_n.shape == (num_layers, batch, hidden_size)
    assert c_n.shape == (num_layers, batch, hidden_size)
    assert bool(jnp.all(jnp.isfinite(logits)))
    assert bool(jnp.all(jnp.isfinite(h_n))) and bool(jnp.all(jnp.isfinite(c_n)))
    print("KERNEL_OK")
</pallas_src>

<mosaic_0001>
module attributes {stable_mosaic.version = 11 : i64} {
  func.func @_matmul_bias_kernel(%arg0: i32, %arg1: i32, %arg2: i32, %arg3: memref<64x32xbf16, #tpu.memory_space<vmem>>, %arg4: memref<32x512xbf16, #tpu.memory_space<vmem>>, %arg5: memref<1x512xf32, #tpu.memory_space<vmem>>, %arg6: memref<64x512xbf16, #tpu.memory_space<vmem>>, %arg7: memref<64x512xf32, #tpu.memory_space<vmem>>) attributes {dimension_semantics = [#tpu.dimension_semantics<parallel>, #tpu.dimension_semantics<parallel>, #tpu.dimension_semantics<arbitrary>], iteration_bounds = array<i64: 1, 1, 1>, scalar_prefetch = 0 : i64, scratch_operands = 1 : i64, tpu.core_type = #tpu.core_type<tc>, window_params = [{transform_indices = @transform_0, window_bounds = array<i64: 64, 32>}, {transform_indices = @transform_1, window_bounds = array<i64: 32, 512>}, {transform_indices = @transform_2, window_bounds = array<i64: 1, 512>}, {transform_indices = @transform_3, window_bounds = array<i64: 64, 512>}]} {
    %c0_i32 = arith.constant 0 : i32
    %0 = arith.cmpi eq, %arg2, %c0_i32 : i32
    %1 = arith.extui %0 : i1 to i32
    %c0_i32_0 = arith.constant 0 : i32
    %2 = arith.cmpi ne, %1, %c0_i32_0 : i32
    scf.if %2 {
      %cst_10 = arith.constant 0.000000e+00 : f32
      %12 = vector.broadcast %cst_10 : f32 to vector<64x512xf32>
      %c0_11 = arith.constant 0 : index
      %c0_12 = arith.constant 0 : index
      %13 = vector.load %arg7[%c0_11, %c0_12] : memref<64x512xf32, #tpu.memory_space<vmem>>, vector<64x512xf32>
      tpu.vector_store %arg7[%c0_11, %c0_12], %12 {strides = array<i32>} : memref<64x512xf32, #tpu.memory_space<vmem>>, vector<64x512xf32>,
    } else {
    }
    %c0 = arith.constant 0 : index
    %c0_1 = arith.constant 0 : index
    %3 = vector.load %arg7[%c0, %c0_1] : memref<64x512xf32, #tpu.memory_space<vmem>>, vector<64x512xf32>
    %c0_2 = arith.constant 0 : index
    %c0_3 = arith.constant 0 : index
    %4 = vector.load %arg3[%c0_2, %c0_3] : memref<64x32xbf16, #tpu.memory_space<vmem>>, vector<64x32xbf16>
    %c0_4 = arith.constant 0 : index
    %c0_5 = arith.constant 0 : index
    %5 = vector.load %arg4[%c0_4, %c0_5] : memref<32x512xbf16, #tpu.memory_space<vmem>>, vector<32x512xbf16>
    %cst = arith.constant dense<0.000000e+00> : vector<64x512xf32>
    %6 = tpu.matmul %4, %5, %cst {dimension_numbers = #tpu.dot_dimension_numbers<[1], [0], [0], [1], [0, 0, 1, 1], [], []>} : vector<64x32xbf16>, vector<32x512xbf16>, vector<64x512xf32> -> vector<64x512xf32>
    %7 = arith.addf %3, %6 : vector<64x512xf32>
    %c0_6 = arith.constant 0 : index
    %c0_7 = arith.constant 0 : index
    %8 = vector.load %arg7[%c0_6, %c0_7] : memref<64x512xf32, #tpu.memory_space<vmem>>, vector<64x512xf32>
    tpu.vector_store %arg7[%c0_6, %c0_7], %7 {strides = array<i32>} : memref<64x512xf32, #tpu.memory_space<vmem>>, vector<64x512xf32>,
    %c0_i32_8 = arith.constant 0 : i32
    %9 = arith.cmpi eq, %arg2, %c0_i32_8 : i32
    %10 = arith.extui %9 : i1 to i32
    %c0_i32_9 = arith.constant 0 : i32
    %11 = arith.cmpi ne, %10, %c0_i32_9 : i32
    scf.if %11 {
      %c0_10 = arith.constant 0 : index
      %c0_11 = arith.constant 0 : index
      %12 = vector.load %arg7[%c0_10, %c0_11] : memref<64x512xf32, #tpu.memory_space<vmem>>, vector<64x512xf32>
      %c0_12 = arith.constant 0 : index
      %c0_13 = arith.constant 0 : index
      %13 = vector.load %arg5[%c0_12, %c0_13] : memref<1x512xf32, #tpu.memory_space<vmem>>, vector<1x512xf32>
      %14 = vector.broadcast %13 : vector<1x512xf32> to vector<64x512xf32>
      %15 = arith.addf %12, %14 : vector<64x512xf32>
      %16 = arith.truncf %15 : vector<64x512xf32> to vector<64x512xbf16>
      %c0_14 = arith.constant 0 : index
      %c0_15 = arith.constant 0 : index
      %17 = vector.load %arg6[%c0_14, %c0_15] : memref<64x512xbf16, #tpu.memory_space<vmem>>, vector<64x512xbf16>
      tpu.vector_store %arg6[%c0_14, %c0_15], %16 {strides = array<i32>} : memref<64x512xbf16, #tpu.memory_space<vmem>>, vector<64x512xbf16>,
    } else {
    }
    return
  }
  func.func @transform_0(%arg0: i32, %arg1: i32, %arg2: i32) -> (i32, i32) {
    %c0_i32 = arith.constant 0 : i32
    return %arg0, %arg2 : i32, i32
  }
  func.func @transform_1(%arg0: i32, %arg1: i32, %arg2: i32) -> (i32, i32) {
    %c0_i32 = arith.constant 0 : i32
    return %arg2, %arg1 : i32, i32
  }
  func.func @transform_2(%arg0: i32, %arg1: i32, %arg2: i32) -> (i32, i32) {
    %c0_i32 = arith.constant 0 : i32
    %c0_i32_0 = arith.constant 0 : i32
    return %c0_i32, %arg1 : i32, i32
  }
  func.func @transform_3(%arg0: i32, %arg1: i32, %arg2: i32) -> (i32, i32) {
    %c0_i32 = arith.constant 0 : i32
    return %arg0, %arg1 : i32, i32
  }
}

</mosaic_0001>

<bundles_post_ra>
// kernel: tpu_custom_call.1
= control target key start
LH: loop header
LB: loop body
LE: loop exit
PB: predicated region body
PF: predicated region fallthrough
CT: control target
= control target key end

     0   :  { %8 = vsyncpa [#allocation4], 0  ;;  %s854_s0 = inlined_call_operand.vmem [shape: bf16[64,32], index: 0, kind: input, shape index: {}]   ;;  %s855_s1 = inlined_call_operand.hbm [shape: bf16[32,512], index: 1, kind: input, shape index: {}]   ;;  %s856_s2 = inlined_call_operand.vmem [shape: f32[1,512], index: 2, kind: input, shape index: {}]   ;;  %s857_s3 = inlined_call_operand.hbm [shape: bf16[64,512], index: 3, kind: output, shape index: {}]  }
   0x1   :  { %9 = vsyncpa [#allocation5], 0  ;;  %s736_s12 = smov [#allocation3]   ;;  %s688_s16 = scalar_lea.hbm %s855_s1, 1024 }
   0x2   :  { %s17_s13 = sshll.u32 %s736_s12, 4  ;;  %p689_p0 = scmp.ne.s32.totalorder %s855_s1, %s688_s16  ;;  %s18_s13 = int_to_ptr.vmem [resolvable:$true] %s17_s13 }
   0x3   :  { %p692_p1 = scmp.lt.u32.totalorder %s688_s16, %s855_s1 }
   0x5   :  { %p694_p2 = pnand %p692_p1, %p689_p0 }
   0x7   :  { %697 = shalt.err (!%p694_p2)
}
   0x8   :  { %s698_s21 = scalar_lea.vmem %s18_s13, 1024  ;;  %p703_p4 = scmp.lt.s32.totalorder %s18_s13, %s18_s13 }
   0x9   :  { %p699_p3 = scmp.ne.s32.totalorder %s18_s13, %s698_s21  ;;  %p704_p5 = scmp.lt.s32.totalorder %s698_s21, %s698_s21 }
   0xb   :  { %p705_p6 = por %p704_p5, %p703_p4 }
   0xd   :  { %p706_p7 = pnand %p705_p6, %p699_p3 }
   0xf   :  { %709 = shalt.err (!%p706_p7)
}
  0x10   :  { %s737_s22 = smov 256   ;;  %s738_s23 = smov 16  }
  0x11   :  { %23 = dma.hbm_to_vmem [thread:$0]  %s855_s1, 1024, %s18_s13, [#allocation4], %s737_s22, %s737_s22, %s738_s23  }
  0x12   :  { %732 = dma.done.wait [#allocation4], 1024  }
  0x13   :  { %733 = vsyncadd [#allocation4], 4294966272  ;;  %v739_v0 = vmov 0   ;;  %v672_v1 = vld [vmem:[#allocation3 + $0x4] ss:$16 sps:$4 sm:$0xff]   ;;  %vm174_vm0 = vcmask 261120   ;;  %v434_v13 = vlaneseq }
  0x14   :  { %219 = vmatprep.mubr.bf16.mxu0 %v739_v0  ;;  %292 = vmatprep.mubr.bf16.mxu1 %v739_v0  ;;  %v674_v2 = vld [vmem:[#allocation3 + $0xc] ss:$16 sps:$4 sm:$0xff]   ;;  %v676_v3 = vld [vmem:[#allocation3] ss:$16 sps:$4 sm:$0xff]   ;;  %v677_v4 = vld [vmem:[#allocation3 + $0x8] ss:$16 sps:$4 sm:$0xff]  }
  0x15   :  { %187 = vmatprep.subr.bf16.mxu0 %v672_v1  ;;  %260 = vmatprep.subr.bf16.mxu1 %v674_v2  ;;  %v678_v5 = vld [vmem:[#allocation3 + $0x24] ss:$16 sps:$4 sm:$0xff]   ;;  %v680_v6 = vld [vmem:[#allocation3 + $0x2c] ss:$16 sps:$4 sm:$0xff]   ;;  %v682_v7 = vld [vmem:[#allocation3 + $0x20] ss:$16 sps:$4 sm:$0xff]  }
  0x16   :  { %188 = vmatpush1.bf16.msra.mxu0 %v676_v3  ;;  %261 = vmatpush1.bf16.msra.mxu1 %v677_v4  ;;  %v683_v8 = vld [vmem:[#allocation3 + $0x28] ss:$16 sps:$4 sm:$0xff]   ;;  %v684_v9 = vld [vmem:[%s854_s0] sm:$0xff]   ;;  %v686_v11 = vld [vmem:[%s854_s0 + $0x10] sm:$0xff]   ;;  %v435_v14 = vshrl.u32 %v434_v13, 7 }
  0x17   :  { %189 = vmatprep.subr.bf16.mxu0 %v678_v5  ;;  %262 = vmatprep.subr.bf16.mxu1 %v680_v6  ;;  %v685_v10 = vld [vmem:[%s854_s0 + $0x8] sm:$0xff]   ;;  %v687_v12 = vld [vmem:[%s854_s0 + $0x18] sm:$0xff]   ;;  %v432_v17 = vld [vmem:[%s856_s2] sm:$0xf]  ;;  %s740_s0 = smov [#allocation6]  }
  0x18   :  { %v436_v15 = vsub.s32 0, %v435_v14  ;;  %v444_v16 = vsub.s32 2, %v435_v14  ;;  %v440_v18 = vsub.s32 1, %v435_v14  ;;  %v448_v19 = vsub.s32 3, %v435_v14  ;;  %s603_s2 = sshll.u32 %s740_s0, 4  ;;  %s604_s2 = int_to_ptr.vmem [resolvable:$true] %s603_s2 }
  0x19   :  { %s710_s8 = scalar_lea.vmem %s604_s2, 2048  ;;  %p715_p9 = scmp.lt.s32.totalorder %s604_s2, %s604_s2 }
  0x1a   :  { %190 = vmatpush1.bf16.msra.mxu0 %v682_v7  ;;  %263 = vmatpush1.bf16.msra.mxu1 %v683_v8  ;;  %v799_v20 = vrot.slane %v432_v17, %v436_v15  ;;  %v801_v21 = vrot.slane %v432_v17, %v444_v16  ;;  %v803_v22 = vrot.slane %v432_v17, %v440_v18  ;;  %p711_p8 = scmp.ne.s32.totalorder %s604_s2, %s710_s8  ;;  %p716_p10 = scmp.lt.s32.totalorder %s710_s8, %s710_s8 }
  0x1b   :  { %v805_v23 = vrot.slane %v432_v17, %v448_v19 }
  0x1c   :  { %p717_p11 = por %p716_p10, %p715_p9 }
  0x1d   :  { %627 = vmatmul.mubr.msk.bf16.vlgmr.msra.gmra.mrb[0].mxu0 %vm174_vm0, %v684_v9  ;;  %631 = vmatmul.mubr.msk.bf16.vlgmr.msra.gmra.mrb[0].mxu1 %vm174_vm0, %v684_v9 }
  0x1e   :  { %229 = vmatprep.mubr.bf16.mxu0 %v739_v0  ;;  %302 = vmatprep.mubr.bf16.mxu1 %v739_v0  ;;  %p718_p12 = pnand %p717_p11, %p711_p8 }
  0x25   :  { %628 = vmatmul.mubr.msk.bf16.gmra.mrb[4].mxu0 %vm174_vm0, %v685_v10  ;;  %632 = vmatmul.mubr.msk.bf16.gmra.mrb[4].mxu1 %vm174_vm0, %v685_v10 }
  0x26   :  { %239 = vmatprep.mubr.bf16.mxu0 %v739_v0  ;;  %312 = vmatprep.mubr.bf16.mxu1 %v739_v0 }
  0x2d   :  { %629 = vmatmul.mubr.msk.bf16.gmra.mrb[8].mxu0 %vm174_vm0, %v686_v11  ;;  %633 = vmatmul.mubr.msk.bf16.gmra.mrb[8].mxu1 %vm174_vm0, %v686_v11 }
  0x2e   :  { %249 = vmatprep.mubr.bf16.mxu0 %v739_v0  ;;  %322 = vmatprep.mubr.bf16.mxu1 %v739_v0 }
  0x35   :  { %630 = vmatmul.mubr.msk.bf16.gmra.mrb[12].mxu0 %vm174_vm0, %v687_v12  ;;  %634 = vmatmul.mubr.msk.bf16.gmra.mrb[12].mxu1 %vm174_vm0, %v687_v12 }
  0xf0   :  { %v221_v24 = vpop.f32.mrb[0].mxu0  ;;  %v294_v25 = vpop.f32.mrb[0].mxu1 }
  0xf1   :  { %v454_v26 = vadd.f32 %v799_v20, %v221_v24  ;;  %v456_v27 = vadd.f32 %v801_v21, %v294_v25  ;;  %v223_v28 = vpop.f32.mrb[1].mxu0  ;;  %v296_v29 = vpop.f32.mrb[1].mxu1 }
  0xf2   :  { %v455_v30 = vadd.f32 %v803_v22, %v223_v28  ;;  %v457_v31 = vadd.f32 %v805_v23, %v296_v29  ;;  %v225_v32 = vpop.f32.mrb[2].mxu0  ;;  %v298_v33 = vpop.f32.mrb[2].mxu1 }
  0xf3   :  { %v458_v34 = vadd.f32 %v799_v20, %v225_v32  ;;  %v460_v35 = vadd.f32 %v801_v21, %v298_v33  ;;  %v227_v36 = vpop.f32.mrb[3].mxu0  ;;  %v300_v37 = vpop.f32.mrb[3].mxu1 }
  0xf4   :  { %v651_v38 = vpack.c.bf16 %v455_v30, %v454_v26  ;;  %v652_v39 = vpack.c.bf16 %v457_v31, %v456_v27  ;;  %v459_v40 = vadd.f32 %v803_v22, %v227_v36  ;;  %v461_v41 = vadd.f32 %v805_v23, %v300_v37 }
  0xf6   :  { %582 = vst [vmem:[#allocation6] sm:$0xff] %v651_v38  ;;  %583 = vst [vmem:[#allocation6 + $0x8] sm:$0xff] %v652_v39  ;;  %v653_v42 = vpack.c.bf16 %v459_v40, %v458_v34  ;;  %v654_v43 = vpack.c.bf16 %v461_v41, %v460_v35 }
  0xf8   :  { %584 = vst [vmem:[#allocation6 + $0x10] sm:$0xff] %v653_v42  ;;  %585 = vst [vmem:[#allocation6 + $0x18] sm:$0xff] %v654_v43  ;;  %v231_v44 = vpop.f32.mrb[4].mxu0  ;;  %v304_v45 = vpop.f32.mrb[4].mxu1 }
  0xf9   :  { %v462_v46 = vadd.f32 %v799_v20, %v231_v44  ;;  %v464_v47 = vadd.f32 %v801_v21, %v304_v45  ;;  %v233_v48 = vpop.f32.mrb[5].mxu0  ;;  %v306_v49 = vpop.f32.mrb[5].mxu1 }
  0xfa   :  { %v463_v50 = vadd.f32 %v803_v22, %v233_v48  ;;  %v465_v51 = vadd.f32 %v805_v23, %v306_v49  ;;  %v235_v52 = vpop.f32.mrb[6].mxu0  ;;  %v308_v53 = vpop.f32.mrb[6].mxu1 }
  0xfb   :  { %v466_v54 = vadd.f32 %v799_v20, %v235_v52  ;;  %v468_v55 = vadd.f32 %v801_v21, %v308_v53  ;;  %v237_v56 = vpop.f32.mrb[7].mxu0  ;;  %v310_v57 = vpop.f32.mrb[7].mxu1 }
  0xfc   :  { %v655_v58 = vpack.c.bf16 %v463_v50, %v462_v46  ;;  %v656_v59 = vpack.c.bf16 %v465_v51, %v464_v47  ;;  %v467_v60 = vadd.f32 %v803_v22, %v237_v56  ;;  %v469_v61 = vadd.f32 %v805_v23, %v310_v57 }
  0xfe   :  { %586 = vst [vmem:[#allocation6 + $0x20] sm:$0xff] %v655_v58  ;;  %587 = vst [vmem:[#allocation6 + $0x28] sm:$0xff] %v656_v59  ;;  %v657_v62 = vpack.c.bf16 %v467_v60, %v466_v54  ;;  %v658_v63 = vpack.c.bf16 %v469_v61, %v468_v55 }
 0x100   :  { %588 = vst [vmem:[#allocation6 + $0x30] sm:$0xff] %v657_v62  ;;  %589 = vst [vmem:[#allocation6 + $0x38] sm:$0xff] %v658_v63  ;;  %v241_v0 = vpop.f32.mrb[8].mxu0  ;;  %v314_v1 = vpop.f32.mrb[8].mxu1 }
 0x101   :  { %v470_v2 = vadd.f32 %v799_v20, %v241_v0  ;;  %v472_v3 = vadd.f32 %v801_v21, %v314_v1  ;;  %v243_v4 = vpop.f32.mrb[9].mxu0  ;;  %v316_v5 = vpop.f32.mrb[9].mxu1 }
 0x102   :  { %v471_v6 = vadd.f32 %v803_v22, %v243_v4  ;;  %v473_v7 = vadd.f32 %v805_v23, %v316_v5  ;;  %v245_v8 = vpop.f32.mrb[10].mxu0  ;;  %v318_v9 = vpop.f32.mrb[10].mxu1 }
 0x103   :  { %v474_v10 = vadd.f32 %v799_v20, %v245_v8  ;;  %v476_v11 = vadd.f32 %v801_v21, %v318_v9  ;;  %v247_v12 = vpop.f32.mrb[11].mxu0  ;;  %v320_v13 = vpop.f32.mrb[11].mxu1 }
 0x104   :  { %v659_v14 = vpack.c.bf16 %v471_v6, %v470_v2  ;;  %v660_v15 = vpack.c.bf16 %v473_v7, %v472_v3  ;;  %v475_v16 = vadd.f32 %v803_v22, %v247_v12  ;;  %v477_v17 = vadd.f32 %v805_v23, %v320_v13 }
 0x106   :  { %590 = vst [vmem:[#allocation6 + $0x40] sm:$0xff] %v659_v14  ;;  %591 = vst [vmem:[#allocation6 + $0x48] sm:$0xff] %v660_v15  ;;  %v661_v18 = vpack.c.bf16 %v475_v16, %v474_v10  ;;  %v662_v19 = vpack.c.bf16 %v477_v17, %v476_v11 }
 0x108   :  { %592 = vst [vmem:[#allocation6 + $0x50] sm:$0xff] %v661_v18  ;;  %593 = vst [vmem:[#allocation6 + $0x58] sm:$0xff] %v662_v19  ;;  %v251_v24 = vpop.f32.mrb[12].mxu0  ;;  %v324_v25 = vpop.f32.mrb[12].mxu1 }
 0x109   :  { %v478_v26 = vadd.f32 %v799_v20, %v251_v24  ;;  %v480_v27 = vadd.f32 %v801_v21, %v324_v25  ;;  %v253_v28 = vpop.f32.mrb[13].mxu0  ;;  %v326_v29 = vpop.f32.mrb[13].mxu1 }
 0x10a   :  { %v479_v30 = vadd.f32 %v803_v22, %v253_v28  ;;  %v481_v31 = vadd.f32 %v805_v23, %v326_v29  ;;  %v255_v32 = vpop.f32.mrb[14].mxu0  ;;  %v328_v33 = vpop.f32.mrb[14].mxu1 }
 0x10b   :  { %v482_v34 = vadd.f32 %v799_v20, %v255_v32  ;;  %v484_v35 = vadd.f32 %v801_v21, %v328_v33  ;;  %v257_v36 = vpop.f32.mrb[15].mxu0  ;;  %v330_v37 = vpop.f32.mrb[15].mxu1 }
 0x10c   :  { %v663_v38 = vpack.c.bf16 %v479_v30, %v478_v26  ;;  %v664_v39 = vpack.c.bf16 %v481_v31, %v480_v27  ;;  %v483_v40 = vadd.f32 %v803_v22, %v257_v36  ;;  %v485_v41 = vadd.f32 %v805_v23, %v330_v37 }
 0x10e   :  { %594 = vst [vmem:[#allocation6 + $0x60] sm:$0xff] %v663_v38  ;;  %595 = vst [vmem:[#allocation6 + $0x68] sm:$0xff] %v664_v39  ;;  %v665_v42 = vpack.c.bf16 %v483_v40, %v482_v34  ;;  %v666_v43 = vpack.c.bf16 %v485_v41, %v484_v35 }
 0x110   :  { %596 = vst [vmem:[#allocation6 + $0x70] sm:$0xff] %v665_v42  ;;  %597 = vst [vmem:[#allocation6 + $0x78] sm:$0xff] %v666_v43 }
 0x111   :  { %721 = shalt.err (!%p718_p12)
}
 0x112   :  { %s722_s11 = scalar_lea.hbm %s857_s3, 2048 }
 0x113   :  { %p723_p13 = scmp.ne.s32.totalorder %s857_s3, %s722_s11  ;;  %p726_p0 = scmp.lt.u32.totalorder %s722_s11, %s857_s3 }
 0x115   :  { %p728_p1 = pnand %p726_p0, %p723_p13 }
 0x117   :  { %731 = shalt.err (!%p728_p1)
}
 0x118   :  { %609 = dma.vmem_to_hbm [thread:$0]  %s604_s2, 2048, %s857_s3, [#allocation5], %s737_s22, %s737_s22, %s738_s23  }
 0x119   :  { %734 = dma.done.wait [#allocation5], 2048  }
 0x11a   :  { %735 = vsyncadd [#allocation5], 4294965248 }
 0x11b   :  { %613 = vsyncpa [#allocation4], 1 }
 0x11c   :  { %614 = vsyncpa [#allocation5], 1 }

</bundles_post_ra>
